<compile_context>
chip_gen: v5e
topology: v5e:2x2
jax: 0.10.0
libtpu: 0.0.40
codegen_flags: <defaults>
</compile_context>

<pallas_src>
import math
import functools

import jax
import jax.numpy as jnp
from jax import lax
from jax.experimental import pallas as pl
from jax.experimental.pallas import tpu as pltpu


def _round_up(x, m):
    return ((x + m - 1) // m) * m


def _vmem_capacity_bytes():
    """Physical per-core VMEM, generation aware, with a conservative fallback."""
    try:
        cap = int(pltpu.get_tpu_info().vmem_capacity_bytes)
        if cap > 0:
            return cap
    except Exception:
        pass
    return 64 * 1024 * 1024  # v7x per-core size = most conservative recent chip


# Only bother single-buffering the (grid-invariant) table block once it is big
# enough for the saved copy to matter; tiny tables keep the default spec.
_SINGLE_BUFFER_TABLE_MIN_BYTES = 2 * 1024 * 1024


def _table_block_spec(vocab_p, d_model_p, table_bytes):
    """Grid-invariant table block: index (0,0) every step -> resident in VMEM.

    For large tables request single buffering (there is nothing to
    double-buffer for an invariant block); this halves the table's VMEM
    footprint and widens the resident window, which matters most on v7x's
    64 MiB-per-core VMEM."""
    if table_bytes >= _SINGLE_BUFFER_TABLE_MIN_BYTES:
        return pl.BlockSpec((vocab_p, d_model_p), lambda i: (0, 0),
                            pipeline_mode=pl.Buffered(1))
    return pl.BlockSpec((vocab_p, d_model_p), lambda i: (0, 0))


# ---------------------------------------------------------------------------
# Path 1: one-hot MXU matmul against a VMEM-resident table.
# ---------------------------------------------------------------------------
def _onehot_mxu_kernel(ids_ref, table_ref, out_ref, *, scale, vocab_p):
    # ids_ref:   (T, 1) int32 tile in VMEM
    # table_ref: (vocab_p, d_model_p) table, resident in VMEM
    # out_ref:   (T, d_model_p) dense, lane-aligned output tile
    T = out_ref.shape[0]
    iota = lax.broadcasted_iota(jnp.int32, (T, vocab_p), 1)
    one_hot = (ids_ref[...] == iota).astype(table_ref.dtype)      # (T, vocab_p)
    # One MXU op produces the whole gathered tile; HIGHEST keeps the one-hot
    # selection exact for f32 tables (for bf16 tables it is exact regardless).
    acc = jnp.dot(one_hot, table_ref[...],
                  preferred_element_type=jnp.float32,
                  precision=lax.Precision.HIGHEST)
    out_ref[...] = (acc * scale).astype(out_ref.dtype)


def _embed_onehot(flat_ids, table_p, num_tiles, T, vocab_p, d_model_p, scale,
                  vmem_cap):
    dtype = table_p.dtype
    itemsize = jnp.dtype(dtype).itemsize
    table_bytes = vocab_p * d_model_p * itemsize
    out_block_bytes = T * d_model_p * itemsize
    onehot_bytes = T * vocab_p * max(itemsize, 4)            # one-hot + f32 acc
    table_live = (table_bytes if table_bytes >= _SINGLE_BUFFER_TABLE_MIN_BYTES
                  else 2 * table_bytes)
    vmem_limit = max(32 << 20,
                     min(table_live + 2 * out_block_bytes + onehot_bytes
                         + (8 << 20),
                         (vmem_cap * 3) // 4))
    kernel = functools.partial(_onehot_mxu_kernel, scale=scale, vocab_p=vocab_p)
    return pl.pallas_call(
        kernel,
        out_shape=jax.ShapeDtypeStruct((num_tiles * T, d_model_p), dtype),
        grid=(num_tiles,),
        in_specs=[
            pl.BlockSpec((T, 1), lambda i: (i, 0)),           # ids column (VMEM)
            _table_block_spec(vocab_p, d_model_p, table_bytes),
        ],
        out_specs=pl.BlockSpec((T, d_model_p), lambda i: (i, 0)),
        compiler_params=pltpu.CompilerParams(
            dimension_semantics=("parallel",),                # tiles independent
            vmem_limit_bytes=int(vmem_limit)),
    )(flat_ids.reshape(-1, 1), table_p)


# ---------------------------------------------------------------------------
# Path 2: VMEM-resident table, raw row copies + one dense scale pass.
# ---------------------------------------------------------------------------
def _rowcopy_kernel(ids_ref, table_ref, out_ref, *, scale):
    # ids_ref:   (T,) int32 tile in SMEM (per-tile block, not whole-array prefetch)
    # table_ref: (vocab_p, d_model_p) table, resident in VMEM
    # out_ref:   (T, d_model_p) dense output tile
    T = out_ref.shape[0]

    def copy_row(t, carry):
        out_ref[t] = table_ref[ids_ref[t]]     # raw row copy, no per-row math
        return carry

    # fori_loop (not a 256-way Python unroll) keeps code size / vreg live
    # ranges bounded while unroll=8 keeps scheduler visibility.
    lax.fori_loop(0, T, copy_row, 0, unroll=8)
    # One dense, lane-aligned VPU pass applies the *sqrt(d_model) scale.
    out_ref[...] = (out_ref[...].astype(jnp.float32) * scale).astype(out_ref.dtype)


def _embed_rowcopy(flat_ids, table_p, num_tiles, T, vocab_p, d_model_p, scale,
                   vmem_cap):
    dtype = table_p.dtype
    itemsize = jnp.dtype(dtype).itemsize
    table_bytes = vocab_p * d_model_p * itemsize
    out_block_bytes = T * d_model_p * itemsize
    table_live = (table_bytes if table_bytes >= _SINGLE_BUFFER_TABLE_MIN_BYTES
                  else 2 * table_bytes)
    vmem_limit = max(32 << 20,
                     min(table_live + 2 * out_block_bytes + (8 << 20),
                         (vmem_cap * 3) // 4))
    kernel = functools.partial(_rowcopy_kernel, scale=scale)
    return pl.pallas_call(
        kernel,
        out_shape=jax.ShapeDtypeStruct((num_tiles * T, d_model_p), dtype),
        grid=(num_tiles,),
        in_specs=[
            pl.BlockSpec((T,), lambda i: (i,),
                         memory_space=pltpu.MemorySpace.SMEM),
            _table_block_spec(vocab_p, d_model_p, table_bytes),
        ],
        out_specs=pl.BlockSpec((T, d_model_p), lambda i: (i, 0)),
        compiler_params=pltpu.CompilerParams(
            dimension_semantics=("parallel",),
            vmem_limit_bytes=int(vmem_limit)),
    )(flat_ids, table_p)


# ---------------------------------------------------------------------------
# Path 3: large table stays in HBM; per-row gather DMAs straight into out_ref.
# ---------------------------------------------------------------------------
def _hbm_gather_kernel(ids_ref, table_hbm, out_ref, sems, *, scale):
    # ids_ref:   (T,) int32 tile in SMEM
    # table_hbm: (vocab, d_model) embedding table, left in HBM (pl.ANY)
    # out_ref:   (T, d_model) output tile in VMEM -- rows are DMA'd straight in,
    #            removing the extra row_buf read+write pass.
    # sems:      (T,) DMA semaphores, one per in-flight row copy
    T = out_ref.shape[0]

    def issue(t, carry):
        pltpu.make_async_copy(table_hbm.at[ids_ref[t]], out_ref.at[t],
                              sems.at[t]).start()
        return carry

    # All scalar id reads + DMA descriptor issues happen before any wait, so
    # every transfer is in flight while later descriptors are still issuing.
    lax.fori_loop(0, T, issue, 0, unroll=8)

    def wait(t, carry):
        # Wait with the exact same sliced shapes used at .start().
        pltpu.make_async_copy(table_hbm.at[ids_ref[t]], out_ref.at[t],
                              sems.at[t]).wait()
        return carry

    lax.fori_loop(0, T, wait, 0, unroll=8)
    # In-place dense scale: one VPU pass, no extra scratch traffic.  No scratch
    # state is carried across grid steps, so "parallel" (megacore split) is
    # safe; the pipelined writeback of tile i overlaps tile i+1's gathers.
    out_ref[...] = (out_ref[...].astype(jnp.float32) * scale).astype(out_ref.dtype)


def _embed_hbm_gather(flat_ids, table, num_tiles, T, scale, vmem_cap):
    vocab, d_model = table.shape
    kernel = functools.partial(_hbm_gather_kernel, scale=scale)
    vmem_limit = min(32 << 20, (vmem_cap * 3) // 4)
    return pl.pallas_call(
        kernel,
        out_shape=jax.ShapeDtypeStruct((num_tiles * T, d_model), table.dtype),
        grid=(num_tiles,),
        in_specs=[
            pl.BlockSpec((T,), lambda i: (i,),
                         memory_space=pltpu.MemorySpace.SMEM),
            pl.BlockSpec(memory_space=pl.ANY),                # table stays in HBM
        ],
        out_specs=pl.BlockSpec((T, d_model), lambda i: (i, 0)),
        scratch_shapes=[pltpu.SemaphoreType.DMA((T,))],
        compiler_params=pltpu.CompilerParams(
            dimension_semantics=("parallel",),
            vmem_limit_bytes=int(vmem_limit)),
    )(flat_ids, table)


# ---------------------------------------------------------------------------
# Wrapper (matches Embeddings.forward semantics)
# ---------------------------------------------------------------------------
def embeddings_forward(ids, table, *, block_tokens=256,
                       small_table_max_bytes=None, onehot_vocab_max=4096,
                       force_path=None):
    """ids: int array of any shape; table: (vocab, d_model) -> (*ids.shape, d_model)."""
    vocab, d_model = table.shape
    lead_shape = ids.shape
    n_tokens = 1
    for s in lead_shape:
        n_tokens *= int(s)
    scale = math.sqrt(d_model)

    # Clamp ids so a bad id can never address an arbitrary HBM row.
    flat_ids = jnp.clip(ids.reshape(-1).astype(jnp.int32), 0, vocab - 1)

    # Tokens per grid step: multiple of 8 (sublane-dense tiles); 256 default
    # amortizes the ~0.35 us/step grid overhead.
    tokens_per_tile = min(_round_up(block_tokens, 8), _round_up(n_tokens, 8))
    n_pad = _round_up(n_tokens, tokens_per_tile)
    if n_pad != n_tokens:
        flat_ids = jnp.pad(flat_ids, (0, n_pad - n_tokens))
    num_tiles = n_pad // tokens_per_tile

    vocab_p = _round_up(vocab, 8)
    d_model_p = _round_up(d_model, 128)
    itemsize = jnp.dtype(table.dtype).itemsize
    padded_table_bytes = vocab_p * d_model_p * itemsize

    vmem_cap = _vmem_capacity_bytes()
    if small_table_max_bytes is None:
        # Generation-aware resident window:
        #   v5e/v6e (128 MiB VMEM) -> ~42 MiB; v7x (64 MiB per core) -> ~21 MiB.
        small_table_max_bytes = min(48 << 20, vmem_cap // 3)

    if force_path is not None:
        path = force_path
    elif (padded_table_bytes <= small_table_max_bytes
          and vocab_p <= onehot_vocab_max):
        path = "onehot"
    elif padded_table_bytes <= small_table_max_bytes:
        path = "vmem_rowcopy"
    else:
        path = "hbm_gather"

    if path in ("onehot", "vmem_rowcopy"):
        table_p = table
        if (vocab_p, d_model_p) != (vocab, d_model):
            table_p = jnp.pad(table, ((0, vocab_p - vocab),
                                      (0, d_model_p - d_model)))
        if path == "onehot":
            out = _embed_onehot(flat_ids, table_p, num_tiles, tokens_per_tile,
                                vocab_p, d_model_p, scale, vmem_cap)
        else:
            out = _embed_rowcopy(flat_ids, table_p, num_tiles, tokens_per_tile,
                                 vocab_p, d_model_p, scale, vmem_cap)
        if n_pad != n_tokens or d_model_p != d_model:
            out = out[:n_tokens, :d_model]
    elif path == "hbm_gather":
        out = _embed_hbm_gather(flat_ids, table, num_tiles, tokens_per_tile,
                                scale, vmem_cap)
        if n_pad != n_tokens:
            out = out[:n_tokens]
    else:
        raise ValueError(f"unknown path: {path!r}")

    return out.reshape(*lead_shape, d_model)


if __name__ == "__main__":
    # Small, module-consistent shapes: x is (B, S) token ids.
    B, S = 2, 8
    vocab, d_model = 50, 32

    key = jax.random.PRNGKey(0)
    k_ids, k_tab = jax.random.split(key)

    # nn.Embedding default init: N(0, 1).
    table = jax.random.normal(k_tab, (vocab, d_model), dtype=jnp.float32)
    ids = jax.random.randint(k_ids, (B, S), 0, vocab, dtype=jnp.int32)

    ref = jnp.take(table, ids, axis=0) * math.sqrt(d_model)

    outs = {
        # Default path for this table size: one-hot MXU against resident table.
        "onehot": embeddings_forward(ids, table),
        # Mid-size-table path: resident table, raw row copies + dense scale.
        "vmem_rowcopy": embeddings_forward(ids, table, force_path="vmem_rowcopy"),
        # Large-table path: per-row HBM gather DMAs straight into the output tile.
        "hbm_gather": embeddings_forward(ids, table, force_path="hbm_gather"),
    }

    for name, out in outs.items():
        out = jax.block_until_ready(out)
        assert out.shape == (B, S, d_model), (name, out.shape)
        assert jnp.allclose(out, ref, atol=1e-4, rtol=1e-4), name

    print("KERNEL_OK")
</pallas_src>

<mosaic_0001>
module attributes {stable_mosaic.version = 11 : i64} {
  func.func @_onehot_mxu_kernel(%arg0: i32, %arg1: memref<16x1xi32, #tpu.memory_space<vmem>>, %arg2: memref<56x128xf32, #tpu.memory_space<vmem>>, %arg3: memref<16x128xf32, #tpu.memory_space<vmem>>) attributes {dimension_semantics = [#tpu.dimension_semantics<parallel>], iteration_bounds = array<i64: 1>, scalar_prefetch = 0 : i64, scratch_operands = 0 : i64, tpu.core_type = #tpu.core_type<tc>, window_params = [{transform_indices = @transform_0, window_bounds = array<i64: 16, 1>}, {pipeline_mode = #tpu.pipeline_mode<synchronous>, transform_indices = @transform_1, window_bounds = array<i64: 56, 128>}, {transform_indices = @transform_2, window_bounds = array<i64: 16, 128>}]} {
    %0 = tpu.iota {dimensions = array<i32: 1>} : vector<16x56xi32>
    %c0 = arith.constant 0 : index
    %c0_0 = arith.constant 0 : index
    %1 = vector.load %arg1[%c0, %c0_0] : memref<16x1xi32, #tpu.memory_space<vmem>>, vector<16x1xi32>
    %2 = vector.broadcast %1 : vector<16x1xi32> to vector<16x56xi32>
    %3 = arith.cmpi eq, %2, %0 : vector<16x56xi32>
    %4 = arith.extui %3 : vector<16x56xi1> to vector<16x56xi32>
    %5 = arith.sitofp %4 : vector<16x56xi32> to vector<16x56xf32>
    %c0_1 = arith.constant 0 : index
    %c0_2 = arith.constant 0 : index
    %6 = vector.load %arg2[%c0_1, %c0_2] : memref<56x128xf32, #tpu.memory_space<vmem>>, vector<56x128xf32>
    %cst = arith.constant dense<0.000000e+00> : vector<16x128xf32>
    %7 = tpu.matmul %5, %6, %cst {dimension_numbers = #tpu.dot_dimension_numbers<[1], [0], [0], [1], [0, 0, 1, 1], [], []>, precision = #tpu.contract_precision<fp32>} : vector<16x56xf32>, vector<56x128xf32>, vector<16x128xf32> -> vector<16x128xf32>
    %cst_3 = arith.constant 5.65685415 : f32
    %8 = vector.broadcast %cst_3 : f32 to vector<16x128xf32>
    %9 = arith.mulf %7, %8 : vector<16x128xf32>
    %c0_4 = arith.constant 0 : index
    %c0_5 = arith.constant 0 : index
    %10 = vector.load %arg3[%c0_4, %c0_5] : memref<16x128xf32, #tpu.memory_space<vmem>>, vector<16x128xf32>
    tpu.vector_store %arg3[%c0_4, %c0_5], %9 {strides = array<i32>} : memref<16x128xf32, #tpu.memory_space<vmem>>, vector<16x128xf32>,
    return
  }
  func.func @transform_0(%arg0: i32) -> (i32, i32) {
    %c0_i32 = arith.constant 0 : i32
    %c0_i32_0 = arith.constant 0 : i32
    return %arg0, %c0_i32 : i32, i32
  }
  func.func @transform_1(%arg0: i32) -> (i32, i32) {
    %c0_i32 = arith.constant 0 : i32
    %c0_i32_0 = arith.constant 0 : i32
    %c0_i32_1 = arith.constant 0 : i32
    return %c0_i32, %c0_i32_0 : i32, i32
  }
  func.func @transform_2(%arg0: i32) -> (i32, i32) {
    %c0_i32 = arith.constant 0 : i32
    %c0_i32_0 = arith.constant 0 : i32
    return %arg0, %c0_i32 : i32, i32
  }
}

</mosaic_0001>

<bundles_post_ra>
// kernel: tpu_custom_call.1
= control target key start
LH: loop header
LB: loop body
LE: loop exit
PB: predicated region body
PF: predicated region fallthrough
CT: control target
= control target key end

     0   :  { %7 = vsyncpa [#allocation3], 0  ;;  %s506_s0 = inlined_call_operand.vmem [shape: s32[16,1], index: 0, kind: input, shape index: {}]   ;;  %s507_s1 = inlined_call_operand.hbm [shape: f32[56,128], index: 1, kind: input, shape index: {}]   ;;  %s508_s2 = inlined_call_operand.hbm [shape: f32[16,128], index: 2, kind: output, shape index: {}]  }
   0x1   :  { %8 = vsyncpa [#allocation4], 0  ;;  %s15_s11 = sshll.u32 %s507_s1, 4  ;;  %s417_s12 = smov [#allocation2]   ;;  %s16_s11 = int_to_ptr.hbm [resolvable:$true] %s15_s11 }
   0x2   :  { %s17_s13 = sshll.u32 %s417_s12, 4  ;;  %s418_s14 = smov 128   ;;  %s18_s13 = int_to_ptr.vmem [resolvable:$true] %s17_s13 }
   0x3   :  { %s419_s15 = smov 8  }
   0x4   :  { %23 = dma.hbm_to_vmem [thread:$0]  %s16_s11, 896, %s18_s13, [#allocation3], %s418_s14, %s418_s14, %s419_s15  }
   0x5   :  { %413 = dma.done.wait [#allocation3], 896  }
   0x6   :  { %414 = vsyncadd [#allocation3], 4294966400  ;;  %v420_v0 = vmov 0   ;;  %v30_v1 = vld [vmem:[%s506_s0] sm:$0xff]  ;;  %v50_v2 = vld [vmem:[#allocation2 + $0x30] sm:$0xff]  ;;  %v28_v45 = vlaneseq  ;;  %vm51_vm0 = vcmask 457728  }
   0x7   :  { %364 = vset.pattern.permute.xlu0 %v420_v0  ;;  %v447_v3 = vand.u32 4294901760, %v50_v2  ;;  %v49_v4 = vld [vmem:[#allocation2 + $0x28] sm:$0xff]  ;;  %v48_v5 = vld [vmem:[#allocation2 + $0x20] sm:$0xff]  ;;  %v47_v6 = vld [vmem:[#allocation2 + $0x18] sm:$0xff]  ;;  %v421_v48 = vmov 0.0   ;;  %s323_s22 = sshll.u32 %s508_s2, 4  ;;  %s324_s22 = int_to_ptr.hbm [resolvable:$true] %s323_s22 }
   0x8   :  { %33 = vperm.xlu0 %364, %v30_v1   ;;  %v449_v7 = vand.u32 4294901760, %v49_v4  ;;  %v451_v8 = vand.u32 4294901760, %v48_v5  ;;  %v453_v9 = vand.u32 4294901760, %v47_v6  ;;  %v46_v10 = vld [vmem:[#allocation2 + $0x10] sm:$0xff]  ;;  %v45_v11 = vld [vmem:[#allocation2 + $0x8] sm:$0xff]  ;;  %v44_v39 = vld [vmem:[#allocation2] sm:$0xff] }
   0x9   :  { %v108_v12 = vsub.f32 %v50_v2, %v447_v3  ;;  %209 = vmatpush.msra.mxu3 %v447_v3  ;;  %v457_v13 = vand.u32 4294901760, %v46_v10  ;;  %68 = vmatpush.msra.mxu0 %v447_v3  ;;  %v460_v14 = vand.u32 4294901760, %v45_v11  ;;  %v31_v21 = vld [vmem:[%s506_s0 + $0x8] sm:$0xff]  ;;  %v79_v40 = vand.u32 4294901760, %v44_v39  ;;  %s422_s0 = smov [#allocation5]  }
   0xa   :  { %v114_v15 = vsub.f32 %v49_v4, %v449_v7  ;;  %v120_v16 = vsub.f32 %v48_v5, %v451_v8  ;;  %v126_v17 = vsub.f32 %v47_v6, %v453_v9  ;;  %v29_v46 = vand.u32 127, %v28_v45  ;;  %s321_s19 = sshll.u32 %s422_s0, 4  ;;  %s322_s19 = int_to_ptr.vmem [resolvable:$true] %s321_s19 }
   0xb   :  { %v109_v18 = vand.u32 4294901760, %v108_v12  ;;  %169 = vmatpush.msra.mxu2 %v108_v12  ;;  %211 = vmatpush.msra.mxu3 %v449_v7  ;;  %v132_v19 = vsub.f32 %v46_v10, %v457_v13  ;;  %v138_v20 = vsub.f32 %v45_v11, %v460_v14  ;;  %v144_v41 = vsub.f32 %v44_v39, %v79_v40 }
   0xc   :  { %v115_v22 = vand.u32 4294901760, %v114_v15  ;;  %v121_v23 = vand.u32 4294901760, %v120_v16  ;;  %v127_v24 = vand.u32 4294901760, %v126_v17  ;;  %70 = vmatpush.msra.mxu0 %v449_v7 }
   0xd   :  { %v110_v25 = vsub.f32 %v108_v12, %v109_v18  ;;  %172 = vmatpush.msra.mxu2 %v114_v15  ;;  %v133_v26 = vand.u32 4294901760, %v132_v19  ;;  %213 = vmatpush.msra.mxu3 %v451_v8  ;;  %v139_v31 = vand.u32 4294901760, %v138_v20  ;;  %v145_v42 = vand.u32 4294901760, %v144_v41 }
   0xe   :  { %v116_v27 = vsub.f32 %v114_v15, %v115_v22  ;;  %v122_v28 = vsub.f32 %v120_v16, %v121_v23  ;;  %72 = vmatpush.msra.mxu0 %v451_v8  ;;  %v128_v30 = vsub.f32 %v126_v17, %v127_v24 }
   0xf   :  { %v111_v29 = vand.u32 4294901760, %v110_v25  ;;  %175 = vmatpush.msra.mxu2 %v120_v16  ;;  %215 = vmatpush.msra.mxu3 %v453_v9  ;;  %v134_v34 = vsub.f32 %v132_v19, %v133_v26  ;;  %v140_v36 = vsub.f32 %v138_v20, %v139_v31  ;;  %v146_v43 = vsub.f32 %v144_v41, %v145_v42 }
  0x10   :  { %36 = vperm.xlu0 %364, %v31_v21   ;;  %v117_v32 = vand.u32 4294901760, %v116_v27  ;;  %74 = vmatpush.msra.mxu0 %v453_v9  ;;  %v123_v33 = vand.u32 4294901760, %v122_v28  ;;  %v129_v35 = vand.u32 4294901760, %v128_v30 }
  0x11   :  { %112 = vmatpush.msra.mxu1 %v111_v29  ;;  %178 = vmatpush.msra.mxu2 %v126_v17  ;;  %v135_v37 = vand.u32 4294901760, %v134_v34  ;;  %v141_v38 = vand.u32 4294901760, %v140_v36  ;;  %v147_v44 = vand.u32 4294901760, %v146_v43 }
  0x12   :  { %217 = vmatpush.msra.mxu3 %v457_v13  ;;  %76 = vmatpush.msra.mxu0 %v457_v13 }
  0x13   :  { %118 = vmatpush.msra.mxu1 %v117_v32  ;;  %181 = vmatpush.msra.mxu2 %v132_v19 }
  0x14   :  { %219 = vmatpush.msra.mxu3 %v460_v14  ;;  %78 = vmatpush.msra.mxu0 %v460_v14 }
  0x15   :  { %124 = vmatpush.msra.mxu1 %v123_v33  ;;  %184 = vmatpush.msra.mxu2 %v138_v20 }
  0x16   :  { %221 = vmatpush.msra.mxu3 %v79_v40  ;;  %80 = vmatpush.msra.mxu0 %v79_v40 }
  0x17   :  { %130 = vmatpush.msra.mxu1 %v129_v35  ;;  %187 = vmatpush.msra.mxu2 %v144_v41 }
  0x18   :  { %351 = vmatpush.msrb.mxu3 %v447_v3  ;;  %247 = vmatpush.msrb.mxu0 %v109_v18 }
  0x19   :  { %136 = vmatpush.msra.mxu1 %v135_v37  ;;  %344 = vmatpush.msrb.mxu2 %v109_v18 }
  0x1a   :  { %352 = vmatpush.msrb.mxu3 %v449_v7  ;;  %251 = vmatpush.msrb.mxu0 %v115_v22 }
  0x1b   :  { %142 = vmatpush.msra.mxu1 %v141_v38  ;;  %345 = vmatpush.msrb.mxu2 %v115_v22 }
  0x1c   :  { %353 = vmatpush.msrb.mxu3 %v451_v8  ;;  %255 = vmatpush.msrb.mxu0 %v121_v23 }
  0x1d   :  { %346 = vmatpush.msrb.mxu2 %v121_v23  ;;  %148 = vmatpush.msra.mxu1 %v147_v44 }
  0x1e   :  { %354 = vmatpush.msrb.mxu3 %v453_v9  ;;  %259 = vmatpush.msrb.mxu0 %v127_v24 }
  0x1f   :  { %291 = vmatpush.msrb.mxu1 %v447_v3  ;;  %347 = vmatpush.msrb.mxu2 %v127_v24 }
  0x20   :  { %355 = vmatpush.msrb.mxu3 %v457_v13  ;;  %263 = vmatpush.msrb.mxu0 %v133_v26 }
  0x21   :  { %293 = vmatpush.msrb.mxu1 %v449_v7  ;;  %348 = vmatpush.msrb.mxu2 %v133_v26 }
  0x22   :  { %356 = vmatpush.msrb.mxu3 %v460_v14  ;;  %267 = vmatpush.msrb.mxu0 %v139_v31 }
  0x23   :  { %295 = vmatpush.msrb.mxu1 %v451_v8  ;;  %349 = vmatpush.msrb.mxu2 %v139_v31 }
  0x24   :  { %357 = vmatpush.msrb.mxu3 %v79_v40  ;;  %271 = vmatpush.msrb.mxu0 %v145_v42 }
  0x25   :  { %297 = vmatpush.msrb.mxu1 %v453_v9  ;;  %350 = vmatpush.msrb.mxu2 %v145_v42 }
  0x27   :  { %299 = vmatpush.msrb.mxu1 %v457_v13 }
  0x29   :  { %301 = vmatpush.msrb.mxu1 %v460_v14 }
  0x2b   :  { %303 = vmatpush.msrb.mxu1 %v79_v40 }
  0x7a   :  { %v34_v47 = vpop.permute.xlu0 %33 }
  0x7b   :  { %vm38_vm1 = vcmp.eq.s32.totalorder %v34_v47, %v29_v46 }
  0x7c   :  { %v336_v49 = vsel %vm38_vm1, 1.0, %v421_v48 }
  0x7d   :  { %338 = vmatmul.msk.f32.vlgmr.msra.gmra.mxu1 %vm51_vm0, %v336_v49  ;;  %v53_v50 = vsel %vm51_vm0, %v336_v49, 0 }
  0x7e   :  { %v82_v51 = vsub.f32 %v53_v50, %v53_v50 }
  0x80   :  { %190 = vmatmul.f32.vlgmr.msra.gmra.mxu2 %v82_v51  ;;  %v83_v52 = vand.u32 4294901760, %v82_v51 }
  0x82   :  { %225 = vmatmul.f32.vlgmr.msra.gmra.mxu3 %v83_v52  ;;  %v37_v53 = vpop.permute.xlu0 %36  ;;  %v84_v54 = vsub.f32 %v82_v51, %v83_v52 }
  0x83   :  { %vm39_vm2 = vcmp.eq.s32.totalorder %v37_v53, %v29_v46 }
  0x84   :  { %v337_v55 = vsel %vm39_vm2, 1.0, %v421_v48  ;;  %v85_v56 = vand.u32 4294901760, %v84_v54 }
  0x85   :  { %339 = vmatmul.msk.f32.gmra.mxu1 %vm51_vm0, %v337_v55  ;;  %v56_v57 = vsel %vm51_vm0, %v337_v55, 0 }
  0x86   :  { %86 = vmatmul.f32.vlgmr.msra.gmra.mxu0 %v85_v56  ;;  %v90_v58 = vsub.f32 %v56_v57, %v56_v57 }
  0x88   :  { %195 = vmatmul.f32.gmra.mxu2 %v90_v58  ;;  %v91_v59 = vand.u32 4294901760, %v90_v58 }
  0x8a   :  { %231 = vmatmul.f32.gmra.mxu3 %v91_v59  ;;  %v92_v60 = vsub.f32 %v90_v58, %v91_v59 }
  0x8c   :  { %v93_v61 = vand.u32 4294901760, %v92_v60 }
  0x8d   :  { %342 = vmatmul.msk.f32.vlgmr.msrb.gmra.mxu1 %vm51_vm0, %v336_v49 }
  0x8e   :  { %94 = vmatmul.f32.gmra.mxu0 %v93_v61 }
  0x90   :  { %341 = vmatmul.msk.f32.vlgmr.msrb.gmra.mxu2 %vm51_vm0, %v337_v55 }
  0x92   :  { %343 = vmatmul.msk.f32.vlgmr.msrb.gmra.mxu3 %vm51_vm0, %v337_v55 }
  0x96   :  { %340 = vmatmul.msk.f32.vlgmr.msrb.gmra.mxu0 %vm51_vm0, %v336_v49 }
  0xfa   :  { %v151_v62 = vpop.f32.mrf.mxu1 }
 0x102   :  { %v155_v2 = vpop.f32.mrf.mxu1 }
 0x103   :  { %v87_v63 = vpop.f32.mrf.mxu0  ;;  %v191_v0 = vpop.f32.mrf.mxu2 }
 0x104   :  { %v152_v3 = vadd.f32 %v151_v62, %v87_v63 }
 0x105   :  { %v226_v1 = vpop.f32.mrf.mxu3 }
 0x106   :  { %v192_v8 = vadd.f32 %v191_v0, %v152_v3 }
 0x108   :  { %v227_v10 = vadd.f32 %v226_v1, %v192_v8 }
 0x10a   :  { %v306_v16 = vpop.f32.mrf.mxu1 }
 0x10b   :  { %v95_v4 = vpop.f32.mrf.mxu0  ;;  %v196_v5 = vpop.f32.mrf.mxu2 }
 0x10c   :  { %v156_v6 = vadd.f32 %v155_v2, %v95_v4 }
 0x10d   :  { %v232_v7 = vpop.f32.mrf.mxu3 }
 0x10e   :  { %v197_v9 = vadd.f32 %v196_v5, %v156_v6 }
 0x110   :  { %v233_v11 = vadd.f32 %v232_v7, %v197_v9 }
 0x113   :  { %v274_v12 = vpop.f32.mrf.mxu0  ;;  %v278_v13 = vpop.f32.mrf.mxu2 }
 0x114   :  { %v275_v14 = vadd.f32 %v274_v12, %v227_v10  ;;  %v279_v15 = vadd.f32 %v278_v13, %v233_v11 }
 0x115   :  { %v310_v17 = vpop.f32.mrf.mxu3 }
 0x116   :  { %v307_v18 = vadd.f32 %v306_v16, %v275_v14  ;;  %v311_v19 = vadd.f32 %v310_v17, %v279_v15 }
 0x118   :  { %v313_v20 = vmul.f32 5.656854, %v307_v18  ;;  %v314_v21 = vmul.f32 5.656854, %v311_v19 }
 0x11a   :  { %315 = vst [vmem:[#allocation5] sm:$0xff] %v313_v20 }
 0x11b   :  { %316 = vst [vmem:[#allocation5 + $0x8] sm:$0xff] %v314_v21 }
 0x11c   :  { %329 = dma.vmem_to_hbm [thread:$0]  %s322_s19, 256, %s324_s22, [#allocation4], %s418_s14, %s418_s14, %s419_s15  }
 0x11d   :  { %415 = dma.done.wait [#allocation4], 256  }
 0x11e   :  { %416 = vsyncadd [#allocation4], 4294967040 }
 0x11f   :  { %334 = vsyncpa [#allocation3], 1 }
 0x120   :  { %335 = vsyncpa [#allocation4], 1 }

</bundles_post_ra>
